<compile_context>
chip_gen: v5e
topology: v5e:2x2
jax: 0.10.0
libtpu: 0.0.40
codegen_flags: <defaults>
</compile_context>

<pallas_src>
import functools

import jax
import jax.numpy as jnp
from jax.experimental import pallas as pl
from jax.experimental.pallas import tpu as pltpu

TEMPERATURE_TRAIN = 0.67     # LWTAMASK sets self.temperature = 0.67 when training
POWER_TRAIN = 2.0            # SuperMask uses p = 2 when training
GUMBEL_EPS = 1e-8


def supermask_kernel(x_ref, m_ref, w_ref, g_ref, p1_ref, p2_ref, o_ref, *,
                     inv_temperature):
    """One row-block of the fused SuperMask forward.

    x_ref  : (R, D)  input rows (streamed)
    m_ref  : (R, F)  mask-feature rows (streamed)
    w_ref  : (F, 2)  [w1 | w2] ln projection weights (resident)
    g_ref  : (R, 2)  [g1 | g2] per-position Gumbel noise
    p1_ref : (R, R)  block-local 0/1 permutation: row r -> row r ^ 1 (resident)
    p2_ref : (R, R)  block-local 0/1 permutation: row r -> row r ^ 2 (resident)
    o_ref  : (R, D)  output rows
    """
    # ln projections for both LWTAMASK sub-modules in one MXU matmul.
    proj = jnp.dot(m_ref[...], w_ref[...], preferred_element_type=jnp.float32)  # (R, 2)
    t = (proj + g_ref[...]) * inv_temperature                                   # (R, 2) logits
    # Zero any non-finite garbage rows of a partial last block so they cannot
    # poison valid rows through the permutation matmuls below (0 * NaN = NaN).
    t = jnp.where(jnp.abs(t) < 1e30, t, 0.0)

    # Partner logits via exact 0/1 permutation matmuls (pairing r^1 and r^2).
    tp1 = jnp.dot(p1_ref[...], t, preferred_element_type=jnp.float32)           # t[r^1]
    tp2 = jnp.dot(p2_ref[...], t, preferred_element_type=jnp.float32)           # t[r^2]

    # 2-way concrete softmax == sigmoid of the logit difference (exact identity).
    x1 = jax.nn.sigmoid(t[:, 0:1] - tp1[:, 0:1])     # shift = 0  mask
    x2 = jax.nn.sigmoid(t[:, 1:2] - tp2[:, 1:2])     # shift = -1 mask

    xi = jnp.sqrt((x1 + 1e-4) ** 2 + (x2 + 1e-4) ** 2)        # p = 2 (training)
    o_ref[...] = (x_ref[...] * xi).astype(o_ref.dtype)


def supermask_forward(x, m, w1, w2, g1, g2, *,
                      temperature=TEMPERATURE_TRAIN, block_rows=512):
    """x: (B, L, D).  m: (B, L, F) with F=512 (ln is Linear(512,1)).
    w1, w2: (F,).  g1, g2: (B, L) Gumbel(0,1) noise for the two concrete samples."""
    B, L, D = x.shape
    Bm, Lm, F = m.shape
    assert (Bm, Lm) == (B, L)
    # Pairing structure of the torch padding/interleaving reduces to l^1 / l^2
    # (and never touches the zero-padded tail) only when L % 4 == 0.
    assert L % 4 == 0, "fused kernel requires sequence length divisible by 4"

    BT = B * L
    x2d = x.reshape(BT, D)
    m2d = m.reshape(BT, F)
    w = jnp.stack([w1, w2], axis=-1).astype(jnp.float32)                    # (F, 2)
    g = jnp.stack([g1.reshape(BT), g2.reshape(BT)], axis=-1).astype(jnp.float32)  # (BT, 2)

    r = min(block_rows, BT)          # large blocks; clamp for tiny problems
    # Block-local partner permutations (exact 0/1 matrices, built once).
    idx = jnp.arange(r, dtype=jnp.int32)
    p1 = ((idx[:, None] ^ 1) == idx[None, :]).astype(jnp.float32)           # (r, r)
    p2 = ((idx[:, None] ^ 2) == idx[None, :]).astype(jnp.float32)           # (r, r)

    grid = (pl.cdiv(BT, r),)
    out2d = pl.pallas_call(
        functools.partial(supermask_kernel, inv_temperature=1.0 / temperature),
        out_shape=jax.ShapeDtypeStruct((BT, D), x.dtype),
        grid_spec=pltpu.PrefetchScalarGridSpec(
            num_scalar_prefetch=0,
            grid=grid,
            in_specs=[
                pl.BlockSpec((r, D), lambda i: (i, 0)),   # input rows    (streamed)
                pl.BlockSpec((r, F), lambda i: (i, 0)),   # m rows        (streamed)
                pl.BlockSpec((F, 2), lambda i: (0, 0)),   # ln weights    (resident)
                pl.BlockSpec((r, 2), lambda i: (i, 0)),   # Gumbel noise
                pl.BlockSpec((r, r), lambda i: (0, 0)),   # partner perm r^1 (resident)
                pl.BlockSpec((r, r), lambda i: (0, 0)),   # partner perm r^2 (resident)
            ],
            out_specs=pl.BlockSpec((r, D), lambda i: (i, 0)),
        ),
        compiler_params=pltpu.CompilerParams(
            dimension_semantics=("parallel",),
            vmem_limit_bytes=32 * 1024 * 1024,   # ~10 MiB used; safe on v5e/v6e/v7x
        ),
    )(x2d, m2d, w, g, p1, p2)
    return out2d.reshape(B, L, D)


# ---------------------------------------------------------------------------
# Plain-JAX reference that mirrors the torch code step by step (same noise).
# ---------------------------------------------------------------------------
def _lwtamask_ref(m, w, g_pos, *, shift, U=2, temperature=TEMPERATURE_TRAIN):
    """LWTAMASK.forward (training=True, hard=False, hidden=True -> returns xi)."""
    B, L, F = m.shape
    hidden_dim = 4 * (L // U) + 4
    K = hidden_dim // U
    mask = jnp.einsum("blf,f->bl", m, w,
                      precision=jax.lax.Precision.HIGHEST)[..., None]       # ln(m): (B,L,1)
    mask2 = jnp.zeros((B, hidden_dim, 1), jnp.float32).at[:, :L, :].set(mask)
    # Gumbel noise is drawn per competition slot; couple it to the per-position
    # noise by routing g_pos through the same padding / interleaving as the mask.
    g_pad = jnp.zeros((B, hidden_dim, 1), jnp.float32).at[:, :L, :].set(g_pos[..., None])
    if shift < 0:
        mask2 = jnp.concatenate([mask2[:, i::U, :] for i in range(U)], axis=-2)
        g_pad = jnp.concatenate([g_pad[:, i::U, :] for i in range(U)], axis=-2)
    mask2 = jnp.reshape(mask2, (-1, K, U))
    g_slots = jnp.reshape(g_pad, (-1, K, U))
    # concrete_sample(mask2, temperature, hard=False)
    xi = jax.nn.softmax((mask2 + g_slots) / temperature, axis=-1)
    xi = xi.reshape(-1, hidden_dim, 1)
    if shift < 0:
        xo = jnp.zeros_like(xi)
        for i in range(U):
            xo = xo.at[:, i::U, 0].set(xi[:, K * i:K * (i + 1), 0])
        xi = xo
    return xi[:, :L, :]                                                       # (B, L, 1)


def supermask_reference(x, m, w1, w2, g1, g2, *,
                        temperature=TEMPERATURE_TRAIN, p=POWER_TRAIN):
    x1 = _lwtamask_ref(m, w1, g1, shift=0, temperature=temperature)
    x2 = _lwtamask_ref(m, w2, g2, shift=-1, temperature=temperature)
    xi = ((x1 + 1e-4) ** p + (x2 + 1e-4) ** p) ** (1.0 / p)
    return x * xi


if __name__ == "__main__":
    key = jax.random.PRNGKey(0)
    k_x, k_m, k_w1, k_w2, k_g1, k_g2 = jax.random.split(key, 6)

    B, L, D, F = 2, 8, 512, 512          # LWTAMASK.ln is Linear(512, 1) -> F = 512
    x = jax.random.normal(k_x, (B, L, D), dtype=jnp.float32)   # SuperMask input
    m = jax.random.normal(k_m, (B, L, F), dtype=jnp.float32)   # mask features

    # ln weights of the two LWTAMASK sub-modules (Linear(512, 1, bias=False)).
    w1 = (1.0 / jnp.sqrt(F)) * jax.random.normal(k_w1, (F,), dtype=jnp.float32)
    w2 = (1.0 / jnp.sqrt(F)) * jax.random.normal(k_w2, (F,), dtype=jnp.float32)

    # Per-position Gumbel(0,1) noise realizations for the two concrete samples.
    u1 = jax.random.uniform(k_g1, (B, L), dtype=jnp.float32)
    u2 = jax.random.uniform(k_g2, (B, L), dtype=jnp.float32)
    g1 = -jnp.log(-jnp.log(u1 + GUMBEL_EPS) + GUMBEL_EPS)
    g2 = -jnp.log(-jnp.log(u2 + GUMBEL_EPS) + GUMBEL_EPS)

    out = supermask_forward(x, m, w1, w2, g1, g2)
    out = jax.block_until_ready(out)

    ref = supermask_reference(x, m, w1, w2, g1, g2)
    assert out.shape == (B, L, D)
    assert out.dtype == x.dtype
    max_err = float(jnp.max(jnp.abs(out - ref)))
    assert jnp.allclose(out, ref, atol=1e-3, rtol=1e-3), max_err

    print("KERNEL_OK")
</pallas_src>

<mosaic_0001>
module attributes {stable_mosaic.version = 11 : i64} {
  func.func @supermask_kernel(%arg0: i32, %arg1: memref<16x512xf32, #tpu.memory_space<vmem>>, %arg2: memref<16x512xf32, #tpu.memory_space<vmem>>, %arg3: memref<512x2xf32, #tpu.memory_space<vmem>>, %arg4: memref<16x2xf32, #tpu.memory_space<vmem>>, %arg5: memref<16x16xf32, #tpu.memory_space<vmem>>, %arg6: memref<16x16xf32, #tpu.memory_space<vmem>>, %arg7: memref<16x512xf32, #tpu.memory_space<vmem>>) attributes {dimension_semantics = [#tpu.dimension_semantics<parallel>], iteration_bounds = array<i64: 1>, scalar_prefetch = 0 : i64, scratch_operands = 0 : i64, tpu.core_type = #tpu.core_type<tc>, window_params = [{transform_indices = @transform_0, window_bounds = array<i64: 16, 512>}, {transform_indices = @transform_1, window_bounds = array<i64: 16, 512>}, {pipeline_mode = #tpu.pipeline_mode<synchronous>, transform_indices = @transform_2, window_bounds = array<i64: 512, 2>}, {transform_indices = @transform_3, window_bounds = array<i64: 16, 2>}, {pipeline_mode = #tpu.pipeline_mode<synchronous>, transform_indices = @transform_4, window_bounds = array<i64: 16, 16>}, {pipeline_mode = #tpu.pipeline_mode<synchronous>, transform_indices = @transform_5, window_bounds = array<i64: 16, 16>}, {transform_indices = @transform_6, window_bounds = array<i64: 16, 512>}]} {
    %c0 = arith.constant 0 : index
    %c0_0 = arith.constant 0 : index
    %0 = vector.load %arg2[%c0, %c0_0] : memref<16x512xf32, #tpu.memory_space<vmem>>, vector<16x512xf32>
    %c0_1 = arith.constant 0 : index
    %c0_2 = arith.constant 0 : index
    %1 = vector.load %arg3[%c0_1, %c0_2] : memref<512x2xf32, #tpu.memory_space<vmem>>, vector<512x2xf32>
    %cst = arith.constant dense<0.000000e+00> : vector<16x2xf32>
    %2 = tpu.matmul %0, %1, %cst {dimension_numbers = #tpu.dot_dimension_numbers<[1], [0], [0], [1], [0, 0, 1, 1], [], []>} : vector<16x512xf32>, vector<512x2xf32>, vector<16x2xf32> -> vector<16x2xf32>
    %c0_3 = arith.constant 0 : index
    %c0_4 = arith.constant 0 : index
    %3 = vector.load %arg4[%c0_3, %c0_4] : memref<16x2xf32, #tpu.memory_space<vmem>>, vector<16x2xf32>
    %4 = arith.addf %2, %3 : vector<16x2xf32>
    %cst_5 = arith.constant 1.49253726 : f32
    %5 = vector.broadcast %cst_5 : f32 to vector<16x2xf32>
    %6 = arith.mulf %4, %5 : vector<16x2xf32>
    %7 = math.absf %6 : vector<16x2xf32>
    %cst_6 = arith.constant 1.000000e+30 : f32
    %8 = vector.broadcast %cst_6 : f32 to vector<16x2xf32>
    %9 = arith.cmpf olt, %7, %8 : vector<16x2xf32>
    %cst_7 = arith.constant 0.000000e+00 : f32
    %10 = vector.broadcast %cst_7 : f32 to vector<16x2xf32>
    %11 = arith.select %9, %6, %10 : vector<16x2xi1>, vector<16x2xf32>
    %c0_8 = arith.constant 0 : index
    %c0_9 = arith.constant 0 : index
    %12 = vector.load %arg5[%c0_8, %c0_9] : memref<16x16xf32, #tpu.memory_space<vmem>>, vector<16x16xf32>
    %cst_10 = arith.constant dense<0.000000e+00> : vector<16x2xf32>
    %13 = tpu.matmul %12, %11, %cst_10 {dimension_numbers = #tpu.dot_dimension_numbers<[1], [0], [0], [1], [0, 0, 1, 1], [], []>} : vector<16x16xf32>, vector<16x2xf32>, vector<16x2xf32> -> vector<16x2xf32>
    %c0_11 = arith.constant 0 : index
    %c0_12 = arith.constant 0 : index
    %14 = vector.load %arg6[%c0_11, %c0_12] : memref<16x16xf32, #tpu.memory_space<vmem>>, vector<16x16xf32>
    %cst_13 = arith.constant dense<0.000000e+00> : vector<16x2xf32>
    %15 = tpu.matmul %14, %11, %cst_13 {dimension_numbers = #tpu.dot_dimension_numbers<[1], [0], [0], [1], [0, 0, 1, 1], [], []>} : vector<16x16xf32>, vector<16x2xf32>, vector<16x2xf32> -> vector<16x2xf32>
    %16 = vector.extract_strided_slice %11 {offsets = [0, 0], sizes = [16, 1], strides = [1, 1]} : vector<16x2xf32> to vector<16x1xf32>
    %17 = vector.extract_strided_slice %13 {offsets = [0, 0], sizes = [16, 1], strides = [1, 1]} : vector<16x2xf32> to vector<16x1xf32>
    %18 = arith.subf %16, %17 : vector<16x1xf32>
    %19 = arith.negf %18 : vector<16x1xf32>
    %20 = math.exp %19 : vector<16x1xf32>
    %cst_14 = arith.constant 1.000000e+00 : f32
    %21 = vector.broadcast %cst_14 : f32 to vector<16x1xf32>
    %22 = arith.addf %21, %20 : vector<16x1xf32>
    %23 = arith.divf %21, %22 : vector<16x1xf32>
    %24 = vector.extract_strided_slice %11 {offsets = [0, 1], sizes = [16, 1], strides = [1, 1]} : vector<16x2xf32> to vector<16x1xf32>
    %25 = vector.extract_strided_slice %15 {offsets = [0, 1], sizes = [16, 1], strides = [1, 1]} : vector<16x2xf32> to vector<16x1xf32>
    %26 = arith.subf %24, %25 : vector<16x1xf32>
    %27 = arith.negf %26 : vector<16x1xf32>
    %28 = math.exp %27 : vector<16x1xf32>
    %cst_15 = arith.constant 1.000000e+00 : f32
    %29 = vector.broadcast %cst_15 : f32 to vector<16x1xf32>
    %30 = arith.addf %29, %28 : vector<16x1xf32>
    %31 = arith.divf %29, %30 : vector<16x1xf32>
    %cst_16 = arith.constant 9.99999974E-5 : f32
    %32 = vector.broadcast %cst_16 : f32 to vector<16x1xf32>
    %33 = arith.addf %23, %32 : vector<16x1xf32>
    %34 = arith.mulf %33, %33 : vector<16x1xf32>
    %cst_17 = arith.constant 9.99999974E-5 : f32
    %35 = vector.broadcast %cst_17 : f32 to vector<16x1xf32>
    %36 = arith.addf %31, %35 : vector<16x1xf32>
    %37 = arith.mulf %36, %36 : vector<16x1xf32>
    %38 = arith.addf %34, %37 : vector<16x1xf32>
    %39 = math.sqrt %38 : vector<16x1xf32>
    %c0_18 = arith.constant 0 : index
    %c0_19 = arith.constant 0 : index
    %40 = vector.load %arg1[%c0_18, %c0_19] : memref<16x512xf32, #tpu.memory_space<vmem>>, vector<16x512xf32>
    %41 = vector.broadcast %39 : vector<16x1xf32> to vector<16x512xf32>
    %42 = arith.mulf %40, %41 : vector<16x512xf32>
    %c0_20 = arith.constant 0 : index
    %c0_21 = arith.constant 0 : index
    %43 = vector.load %arg7[%c0_20, %c0_21] : memref<16x512xf32, #tpu.memory_space<vmem>>, vector<16x512xf32>
    tpu.vector_store %arg7[%c0_20, %c0_21], %42 {strides = array<i32>} : memref<16x512xf32, #tpu.memory_space<vmem>>, vector<16x512xf32>,
    return
  }
  func.func @transform_0(%arg0: i32) -> (i32, i32) {
    %c0_i32 = arith.constant 0 : i32
    %c0_i32_0 = arith.constant 0 : i32
    return %arg0, %c0_i32 : i32, i32
  }
  func.func @transform_1(%arg0: i32) -> (i32, i32) {
    %c0_i32 = arith.constant 0 : i32
    %c0_i32_0 = arith.constant 0 : i32
    return %arg0, %c0_i32 : i32, i32
  }
  func.func @transform_2(%arg0: i32) -> (i32, i32) {
    %c0_i32 = arith.constant 0 : i32
    %c0_i32_0 = arith.constant 0 : i32
    %c0_i32_1 = arith.constant 0 : i32
    return %c0_i32, %c0_i32_0 : i32, i32
  }
  func.func @transform_3(%arg0: i32) -> (i32, i32) {
    %c0_i32 = arith.constant 0 : i32
    %c0_i32_0 = arith.constant 0 : i32
    return %arg0, %c0_i32 : i32, i32
  }
  func.func @transform_4(%arg0: i32) -> (i32, i32) {
    %c0_i32 = arith.constant 0 : i32
    %c0_i32_0 = arith.constant 0 : i32
    %c0_i32_1 = arith.constant 0 : i32
    return %c0_i32, %c0_i32_0 : i32, i32
  }
  func.func @transform_5(%arg0: i32) -> (i32, i32) {
    %c0_i32 = arith.constant 0 : i32
    %c0_i32_0 = arith.constant 0 : i32
    %c0_i32_1 = arith.constant 0 : i32
    return %c0_i32, %c0_i32_0 : i32, i32
  }
  func.func @transform_6(%arg0: i32) -> (i32, i32) {
    %c0_i32 = arith.constant 0 : i32
    %c0_i32_0 = arith.constant 0 : i32
    return %arg0, %c0_i32 : i32, i32
  }
}

</mosaic_0001>

<bundles_post_ra>
// kernel: tpu_custom_call.1
= control target key start
LH: loop header
LB: loop body
LE: loop exit
PB: predicated region body
PF: predicated region fallthrough
CT: control target
= control target key end

     0   :  { %s827_s0 = inlined_call_operand.vmem [shape: f32[16,512], index: 0, kind: input, shape index: {}]   ;;  %s828_s1 = inlined_call_operand.vmem [shape: f32[16,512], index: 1, kind: input, shape index: {}]   ;;  %s829_s2 = inlined_call_operand.vmem [shape: f32[512,2], index: 2, kind: input, shape index: {}]   ;;  %s830_s3 = inlined_call_operand.vmem [shape: f32[16,2], index: 3, kind: input, shape index: {}]   ;;  %s831_s4 = inlined_call_operand.vmem [shape: f32[16,16], index: 4, kind: input, shape index: {}]   ;;  %s832_s5 = inlined_call_operand.vmem [shape: f32[16,16], index: 5, kind: input, shape index: {}]   ;;  %s833_s6 = inlined_call_operand.hbm [shape: f32[16,512], index: 6, kind: output, shape index: {}]  }
   0x1   :  { %v79_v0 = vld [vmem:[%s829_s2 + $0x178] sm:$0xff]  ;;  %v78_v2 = vld [vmem:[%s829_s2 + $0x170] sm:$0xff]  ;;  %v77_v6 = vld [vmem:[%s829_s2 + $0x168] sm:$0xff] }
   0x2   :  { %v47_v1 = vld [vmem:[%s829_s2 + $0x78] sm:$0xff]  ;;  %144 = vmatpush.msra.mxu2 %v79_v0  ;;  %v46_v4 = vld [vmem:[%s829_s2 + $0x70] sm:$0xff]  ;;  %v45_v8 = vld [vmem:[%s829_s2 + $0x68] sm:$0xff] }
   0x3   :  { %98 = vmatpush.msra.mxu0 %v47_v1  ;;  %v95_v3 = vld [vmem:[%s829_s2 + $0x1f8] sm:$0xff]  ;;  %v94_v7 = vld [vmem:[%s829_s2 + $0x1f0] sm:$0xff]  ;;  %v93_v10 = vld [vmem:[%s829_s2 + $0x1e8] sm:$0xff] }
   0x4   :  { %v63_v5 = vld [vmem:[%s829_s2 + $0xf8] sm:$0xff]  ;;  %167 = vmatpush.msra.mxu3 %v95_v3  ;;  %145 = vmatpush.msra.mxu2 %v78_v2  ;;  %v62_v9 = vld [vmem:[%s829_s2 + $0xf0] sm:$0xff]  ;;  %v76_v11 = vld [vmem:[%s829_s2 + $0x160] sm:$0xff] }
   0x5   :  { %121 = vmatpush.msra.mxu1 %v63_v5  ;;  %99 = vmatpush.msra.mxu0 %v46_v4  ;;  %v44_v12 = vld [vmem:[%s829_s2 + $0x60] sm:$0xff]  ;;  %v61_v13 = vld [vmem:[%s829_s2 + $0xe8] sm:$0xff]  ;;  %v75_v16 = vld [vmem:[%s829_s2 + $0x158] sm:$0xff] }
   0x6   :  { %168 = vmatpush.msra.mxu3 %v94_v7  ;;  %146 = vmatpush.msra.mxu2 %v77_v6  ;;  %v92_v14 = vld [vmem:[%s829_s2 + $0x1e0] sm:$0xff]  ;;  %v43_v17 = vld [vmem:[%s829_s2 + $0x58] sm:$0xff]  ;;  %v74_v20 = vld [vmem:[%s829_s2 + $0x150] sm:$0xff] }
   0x7   :  { %122 = vmatpush.msra.mxu1 %v62_v9  ;;  %100 = vmatpush.msra.mxu0 %v45_v8  ;;  %v60_v15 = vld [vmem:[%s829_s2 + $0xe0] sm:$0xff]  ;;  %v91_v18 = vld [vmem:[%s829_s2 + $0x1d8] sm:$0xff]  ;;  %v42_v21 = vld [vmem:[%s829_s2 + $0x50] sm:$0xff] }
   0x8   :  { %169 = vmatpush.msra.mxu3 %v93_v10  ;;  %147 = vmatpush.msra.mxu2 %v76_v11  ;;  %v59_v19 = vld [vmem:[%s829_s2 + $0xd8] sm:$0xff]  ;;  %v90_v22 = vld [vmem:[%s829_s2 + $0x1d0] sm:$0xff]  ;;  %v73_v24 = vld [vmem:[%s829_s2 + $0x148] sm:$0xff] }
   0x9   :  { %123 = vmatpush.msra.mxu1 %v61_v13  ;;  %101 = vmatpush.msra.mxu0 %v44_v12  ;;  %v58_v23 = vld [vmem:[%s829_s2 + $0xd0] sm:$0xff]  ;;  %v41_v25 = vld [vmem:[%s829_s2 + $0x48] sm:$0xff]  ;;  %v72_v28 = vld [vmem:[%s829_s2 + $0x140] sm:$0xff] }
   0xa   :  { %170 = vmatpush.msra.mxu3 %v92_v14  ;;  %148 = vmatpush.msra.mxu2 %v75_v16  ;;  %v89_v26 = vld [vmem:[%s829_s2 + $0x1c8] sm:$0xff]  ;;  %v40_v29 = vld [vmem:[%s829_s2 + $0x40] sm:$0xff]  ;;  %v71_v32 = vld [vmem:[%s829_s2 + $0x138] sm:$0xff] }
   0xb   :  { %124 = vmatpush.msra.mxu1 %v60_v15  ;;  %102 = vmatpush.msra.mxu0 %v43_v17  ;;  %v57_v27 = vld [vmem:[%s829_s2 + $0xc8] sm:$0xff]  ;;  %v88_v30 = vld [vmem:[%s829_s2 + $0x1c0] sm:$0xff]  ;;  %v39_v33 = vld [vmem:[%s829_s2 + $0x38] sm:$0xff] }
   0xc   :  { %171 = vmatpush.msra.mxu3 %v91_v18  ;;  %149 = vmatpush.msra.mxu2 %v74_v20  ;;  %v56_v31 = vld [vmem:[%s829_s2 + $0xc0] sm:$0xff]  ;;  %v87_v34 = vld [vmem:[%s829_s2 + $0x1b8] sm:$0xff]  ;;  %v70_v36 = vld [vmem:[%s829_s2 + $0x130] sm:$0xff] }
   0xd   :  { %125 = vmatpush.msra.mxu1 %v59_v19  ;;  %103 = vmatpush.msra.mxu0 %v42_v21  ;;  %v55_v35 = vld [vmem:[%s829_s2 + $0xb8] sm:$0xff]  ;;  %v38_v37 = vld [vmem:[%s829_s2 + $0x30] sm:$0xff]  ;;  %v69_v40 = vld [vmem:[%s829_s2 + $0x128] sm:$0xff] }
   0xe   :  { %172 = vmatpush.msra.mxu3 %v90_v22  ;;  %150 = vmatpush.msra.mxu2 %v73_v24  ;;  %v86_v38 = vld [vmem:[%s829_s2 + $0x1b0] sm:$0xff]  ;;  %v37_v41 = vld [vmem:[%s829_s2 + $0x28] sm:$0xff]  ;;  %v68_v44 = vld [vmem:[%s829_s2 + $0x120] sm:$0xff] }
   0xf   :  { %126 = vmatpush.msra.mxu1 %v58_v23  ;;  %104 = vmatpush.msra.mxu0 %v41_v25  ;;  %v54_v39 = vld [vmem:[%s829_s2 + $0xb0] sm:$0xff]  ;;  %v85_v42 = vld [vmem:[%s829_s2 + $0x1a8] sm:$0xff]  ;;  %v36_v45 = vld [vmem:[%s829_s2 + $0x20] sm:$0xff] }
  0x10   :  { %173 = vmatpush.msra.mxu3 %v89_v26  ;;  %151 = vmatpush.msra.mxu2 %v72_v28  ;;  %v53_v43 = vld [vmem:[%s829_s2 + $0xa8] sm:$0xff]  ;;  %v84_v46 = vld [vmem:[%s829_s2 + $0x1a0] sm:$0xff]  ;;  %v67_v48 = vld [vmem:[%s829_s2 + $0x118] sm:$0xff] }
  0x11   :  { %127 = vmatpush.msra.mxu1 %v57_v27  ;;  %105 = vmatpush.msra.mxu0 %v40_v29  ;;  %v52_v47 = vld [vmem:[%s829_s2 + $0xa0] sm:$0xff]  ;;  %v35_v49 = vld [vmem:[%s829_s2 + $0x18] sm:$0xff]  ;;  %v66_v52 = vld [vmem:[%s829_s2 + $0x110] sm:$0xff] }
  0x12   :  { %174 = vmatpush.msra.mxu3 %v88_v30  ;;  %152 = vmatpush.msra.mxu2 %v71_v32  ;;  %v83_v50 = vld [vmem:[%s829_s2 + $0x198] sm:$0xff]  ;;  %v34_v53 = vld [vmem:[%s829_s2 + $0x10] sm:$0xff] }
  0x13   :  { %128 = vmatpush.msra.mxu1 %v56_v31  ;;  %106 = vmatpush.msra.mxu0 %v39_v33  ;;  %v51_v51 = vld [vmem:[%s829_s2 + $0x98] sm:$0xff] }
  0x14   :  { %175 = vmatpush.msra.mxu3 %v87_v34  ;;  %153 = vmatpush.msra.mxu2 %v70_v36 }
  0x15   :  { %129 = vmatpush.msra.mxu1 %v55_v35  ;;  %107 = vmatpush.msra.mxu0 %v38_v37 }
  0x16   :  { %176 = vmatpush.msra.mxu3 %v86_v38  ;;  %154 = vmatpush.msra.mxu2 %v69_v40 }
  0x17   :  { %130 = vmatpush.msra.mxu1 %v54_v39  ;;  %108 = vmatpush.msra.mxu0 %v37_v41 }
  0x18   :  { %177 = vmatpush.msra.mxu3 %v85_v42  ;;  %155 = vmatpush.msra.mxu2 %v68_v44 }
  0x19   :  { %131 = vmatpush.msra.mxu1 %v53_v43  ;;  %109 = vmatpush.msra.mxu0 %v36_v45 }
  0x1a   :  { %178 = vmatpush.msra.mxu3 %v84_v46 }
  0x1b   :  { %132 = vmatpush.msra.mxu1 %v52_v47 }
  0x1c   :  { %11 = vsyncpa [#allocation3], 0  ;;  %156 = vmatpush.msra.mxu2 %v67_v48  ;;  %110 = vmatpush.msra.mxu0 %v35_v49  ;;  %v82_v54 = vld [vmem:[%s829_s2 + $0x190] sm:$0xff]  ;;  %v65_v56 = vld [vmem:[%s829_s2 + $0x108] sm:$0xff]  ;;  %vm200_vm2 = vcmask 130048   ;;  %s506_s20 = smov [#allocation2]  }
  0x1d   :  { %v50_v55 = vld [vmem:[%s829_s2 + $0x90] sm:$0xff]  ;;  %179 = vmatpush.msra.mxu3 %v83_v50  ;;  %133 = vmatpush.msra.mxu1 %v51_v51  ;;  %v33_v57 = vld [vmem:[%s829_s2 + $0x8] sm:$0xff]  ;;  %v64_v60 = vld [vmem:[%s829_s2 + $0x100] sm:$0xff]  ;;  %s421_s21 = sshll.u32 %s506_s20, 4  ;;  %s508_s24 = smov 32   ;;  %s422_s21 = int_to_ptr.vmem [resolvable:$true] %s421_s21 }
  0x1e   :  { %157 = vmatpush.msra.mxu2 %v66_v52  ;;  %111 = vmatpush.msra.mxu0 %v34_v53  ;;  %v81_v58 = vld [vmem:[%s829_s2 + $0x188] sm:$0xff]  ;;  %v32_v61 = vld [vmem:[%s829_s2] sm:$0xff]  ;;  %v26_v62 = vld [vmem:[%s828_s1 + $0x10] sm:$0xff] }
  0x1f   :  { %v49_v59 = vld [vmem:[%s829_s2 + $0x88] sm:$0xff]  ;;  %180 = vmatpush.msra.mxu3 %v82_v54  ;;  %134 = vmatpush.msra.mxu1 %v50_v55  ;;  %v80_v63 = vld [vmem:[%s829_s2 + $0x180] sm:$0xff]  ;;  %v27_v1 = vld [vmem:[%s828_s1 + $0x18] sm:$0xff] }
  0x20   :  { %158 = vmatpush.msra.mxu2 %v65_v56  ;;  %112 = vmatpush.msra.mxu0 %v33_v57  ;;  %v24_v0 = vld [vmem:[%s828_s1] sm:$0xff]  ;;  %v25_v3 = vld [vmem:[%s828_s1 + $0x8] sm:$0xff]  ;;  %v30_v4 = vld [vmem:[%s828_s1 + $0x30] sm:$0xff] }
  0x21   :  { %181 = vmatpush.msra.mxu3 %v81_v58  ;;  %135 = vmatpush.msra.mxu1 %v49_v59  ;;  %v48_v2 = vld [vmem:[%s829_s2 + $0x80] sm:$0xff]  ;;  %v31_v6 = vld [vmem:[%s828_s1 + $0x38] sm:$0xff]  ;;  %v29_v7 = vld [vmem:[%s828_s1 + $0x28] sm:$0xff] }
  0x22   :  { %159 = vmatpush.msra.mxu2 %v64_v60  ;;  %113 = vmatpush.msra.mxu0 %v32_v61  ;;  %v28_v5 = vld [vmem:[%s828_s1 + $0x20] sm:$0xff]  ;;  %v97_v16 = vld [vmem:[%s830_s3 + $0x8] sm:$0xff]  ;;  %s423_s1 = sshll.u32 %s833_s6, 4  ;;  %s424_s1 = int_to_ptr.hbm [resolvable:$true] %s423_s1 }
  0x23   :  { %160 = vmatmul.f32.vlgmr.msra.gmra.mxu2 %v26_v62  ;;  %182 = vmatpush.msra.mxu3 %v80_v63  ;;  %v96_v8 = vld [vmem:[%s830_s3] sm:$0xff]  ;;  %v199_v34 = vld [vmem:[%s831_s4 + $0x8] sm:$0xff]  ;;  %s507_s3 = smov 512  }
  0x24   :  { %114 = vmatmul.f32.vlgmr.msra.gmra.mxu0 %v24_v0  ;;  %183 = vmatmul.f32.vlgmr.msra.gmra.mxu3 %v27_v1  ;;  %v198_v33 = vld [vmem:[%s831_s4] sm:$0xff]  ;;  %v231_v36 = vld [vmem:[%s832_s5 + $0x8] sm:$0xff]  ;;  %s504_s4 = smov 127  }
  0x25   :  { %136 = vmatpush.msra.mxu1 %v48_v2  ;;  %v230_v35 = vld [vmem:[%s832_s5] sm:$0xff] }
  0x26   :  { %137 = vmatmul.f32.vlgmr.msra.gmra.mxu1 %v25_v3 }
  0x2b   :  { %163 = vmatmul.f32.gmra.mxu2 %v30_v4 }
  0x2c   :  { %117 = vmatmul.f32.gmra.mxu0 %v28_v5  ;;  %186 = vmatmul.f32.gmra.mxu3 %v31_v6 }
  0x2e   :  { %140 = vmatmul.f32.gmra.mxu1 %v29_v7 }
  0xa1   :  { %v115_v9 = vpop.f32.mrf.mxu0 }
  0xa2   :  { %v116_v10 = vadd.f32 %v115_v9, %v96_v8 }
  0xa3   :  { %v138_v11 = vpop.f32.mrf.mxu1 }
  0xa4   :  { %v139_v12 = vadd.f32 %v138_v11, %v116_v10 }
  0xa6   :  { %v161_v13 = vpop.f32.mrf.mxu2 }
  0xa7   :  { %v162_v14 = vadd.f32 %v161_v13, %v139_v12  ;;  %v184_v15 = vpop.f32.mrf.mxu3 }
  0xa9   :  { %v185_v17 = vadd.f32 %v184_v15, %v162_v14  ;;  %v118_v18 = vpop.f32.mrf.mxu0 }
  0xaa   :  { %v119_v19 = vadd.f32 %v118_v18, %v97_v16 }
  0xab   :  { %v190_v20 = vmul.f32 1.4925373, %v185_v17  ;;  %v141_v21 = vpop.f32.mrf.mxu1 }
  0xac   :  { %v142_v22 = vadd.f32 %v141_v21, %v119_v19  ;;  %v505_v21 = vmov 0  }
  0xad   :  { %v192_v23 = vand.u32 2147483647, %v190_v20  ;;  %456 = vset.pattern.permute.xlu1 %v505_v21  ;;  %457 = vset.pattern.permute.xlu0 %v505_v21 }
  0xae   :  { %v164_v24 = vpop.f32.mrf.mxu2 }
  0xaf   :  { %v165_v25 = vadd.f32 %v164_v24, %v142_v22  ;;  %v187_v26 = vpop.f32.mrf.mxu3  ;;  %vm766_vm0 = vcmp.lt.f32.partialorder %v192_v23, 1e+30 }
  0xb0   :  { %v772_v28 = vsel %vm766_vm0, %v190_v20, 0.0 }
  0xb1   :  { %v188_v29 = vadd.f32 %v187_v26, %v165_v25 }
  0xb3   :  { %v191_v30 = vmul.f32 1.4925373, %v188_v29 }
  0xb5   :  { %v193_v31 = vand.u32 2147483647, %v191_v30 }
  0xb7   :  { %vm195_vm1 = vcmp.lt.f32.partialorder %v193_v31, 1e+30 }
  0xb8   :  { %435 = vmatpush.msk.msrb.mxu0 %vm195_vm1, %v191_v30  ;;  %447 = vmatpush.msk.msrb.mxu2 %vm195_vm1, %v191_v30  ;;  %v774_v32 = vsel %vm195_vm1, %v191_v30, 0.0 }
  0xb9   :  { %439 = vmatpush.msk.msrb.mxu1 %vm195_vm1, %v191_v30  ;;  %449 = vmatpush.msk.msrb.mxu3 %vm195_vm1, %v191_v30 }
  0xba   :  { %436 = vmatpush.msk.msrb.mxu0 %vm766_vm0, %v190_v20  ;;  %448 = vmatpush.msk.msrb.mxu2 %vm766_vm0, %v190_v20 }
  0xbb   :  { %440 = vmatpush.msk.msrb.mxu1 %vm766_vm0, %v190_v20  ;;  %450 = vmatpush.msk.msrb.mxu3 %vm766_vm0, %v190_v20 }
  0xbc   :  { %437 = vmatmul.msk.f32.vlgmr.msrb.gmra.mxu0 %vm200_vm2, %v198_v33  ;;  %438 = vmatmul.msk.f32.vlgmr.msrb.gmra.mxu2 %vm200_vm2, %v199_v34 }
  0xbd   :  { %441 = vmatmul.msk.f32.vlgmr.msrb.gmra.mxu1 %vm200_vm2, %v230_v35  ;;  %442 = vmatmul.msk.f32.vlgmr.msrb.gmra.mxu3 %vm200_vm2, %v231_v36 }
 0x139   :  { %v224_v7 = vpop.f32.mrf.mxu0 }
 0x13a   :  { %v255_v37 = vpop.f32.mrf.mxu1  ;;  %v261_v8 = vsub.f32 %v772_v28, %v224_v7 }
 0x13b   :  { %v301_v38 = vsub.f32 %v772_v28, %v255_v37 }
 0x13c   :  { %v443_v9 = vmul.f32 -1.442695, %v261_v8 }
 0x13d   :  { %v445_v39 = vmul.f32 -1.442695, %v301_v38 }
 0x13f   :  { %458 = vpow2.f32 %v445_v39  ;;  %v227_v10 = vpop.f32.mrf.mxu2 }
 0x140   :  { %v258_v40 = vpop.f32.mrf.mxu3  ;;  %v262_v11 = vsub.f32 %v774_v32, %v227_v10 }
 0x141   :  { %v302_v41 = vsub.f32 %v774_v32, %v258_v40 }
 0x142   :  { %v444_v12 = vmul.f32 -1.442695, %v262_v11  ;;  %v387_v11 = vld [vmem:[%s827_s0 + $0x20] sm:$0xff] }
 0x143   :  { %v446_v42 = vmul.f32 -1.442695, %v302_v41 }
 0x145   :  { %v459_v43 = vpop.eup %458  ;;  %460 = vpow2.f32 %v446_v42 }
 0x146   :  { %v309_v44 = vadd.f32 1.0, %v459_v43 }
 0x148   :  { %462 = vrcp.f32 %v309_v44  ;;  %v322_v50 = vand.u32 2147483648, %v309_v44  ;;  %v320_v52 = vand.u32 2147483647, %v309_v44  ;;  %vm316_vm4 = vweird.f32 %v309_v44 }
 0x14a   :  { %v323_v56 = vor.u32 1.1754944e-38, %v322_v50  ;;  %vm321_vm6 = vcmp.eq.f32.partialorder %v320_v52, 8.507059e+37 }
 0x14b   :  { %v461_v45 = vpop.eup %460 }
 0x14c   :  { %v310_v46 = vadd.f32 1.0, %v461_v45 }
 0x14e   :  { %v463_v47 = vpop.eup %462  ;;  %464 = vrcp.f32 %v310_v46  ;;  %v337_v60 = vand.u32 2147483648, %v310_v46  ;;  %v335_v63 = vand.u32 2147483647, %v310_v46  ;;  %vm331_vm8 = vweird.f32 %v310_v46 }
 0x14f   :  { %v312_v48 = vmul.f32 %v463_v47, %v309_v44  ;;  %vm317_vm3 = vweird.f32 %v463_v47  ;;  %466 = vpow2.f32 %v443_v9 }
 0x150   :  { %vm318_vm5 = vmor %vm316_vm4, %vm317_vm3  ;;  %v338_v2 = vor.u32 1.1754944e-38, %v337_v60  ;;  %vm336_vm10 = vcmp.eq.f32.partialorder %v335_v63, 8.507059e+37  ;;  %468 = vpow2.f32 %v444_v12  ;;  %v388_v12 = vld [vmem:[%s827_s0 + $0x28] sm:$0xff] }
 0x151   :  { %v313_v49 = vsub.f32 1.0, %v312_v48 }
 0x153   :  { %v314_v51 = vmul.f32 %v463_v47, %v313_v49 }
 0x154   :  { %v465_v53 = vpop.eup %464 }
 0x155   :  { %v327_v54 = vmul.f32 %v465_v53, %v310_v46  ;;  %v315_v55 = vadd.f32 %v463_v47, %v314_v51  ;;  %vm332_vm7 = vweird.f32 %v465_v53  ;;  %v467_v13 = vpop.eup %466 }
 0x156   :  { %vm333_vm9 = vmor %vm331_vm8, %vm332_vm7  ;;  %v269_v14 = vadd.f32 1.0, %v467_v13  ;;  %v469_v15 = vpop.eup %468  ;;  %v389_v13 = vld [vmem:[%s827_s0 + $0x30] sm:$0xff] }
 0x157   :  { %v319_v57 = vsel %vm318_vm5, %v463_v47, %v315_v55  ;;  %v328_v58 = vsub.f32 1.0, %v327_v54  ;;  %v270_v16 = vadd.f32 1.0, %v469_v15 }
 0x158   :  { %v324_v59 = vsel %vm321_vm6, %v323_v56, %v319_v57  ;;  %470 = vrcp.f32 %v269_v14  ;;  %v282_v26 = vand.u32 2147483648, %v269_v14  ;;  %vm276_vm12 = vweird.f32 %v269_v14 }
 0x159   :  { %v345_v61 = vadd.f32 0.0001, %v324_v59  ;;  %v329_v62 = vmul.f32 %v465_v53, %v328_v58  ;;  %472 = vrcp.f32 %v270_v16  ;;  %v280_v27 = vand.u32 2147483647, %v269_v14 }
 0x15a   :  { %v283_v30 = vor.u32 1.1754944e-38, %v282_v26  ;;  %v297_v33 = vand.u32 2147483648, %v270_v16  ;;  %vm291_vm0 = vweird.f32 %v270_v16  ;;  %v295_v35 = vand.u32 2147483647, %v270_v16 }
 0x15b   :  { %v347_v0 = vmul.f32 %v345_v61, %v345_v61  ;;  %v330_v1 = vadd.f32 %v465_v53, %v329_v62  ;;  %vm281_vm14 = vcmp.eq.f32.partialorder %v280_v27, 8.507059e+37 }
 0x15c   :  { %v298_v37 = vor.u32 1.1754944e-38, %v297_v33  ;;  %vm296_vm2 = vcmp.eq.f32.partialorder %v295_v35, 8.507059e+37 }
 0x15d   :  { %351 = vrot.lane.b32.xlu0 %v347_v0, %s504_s4  ;;  %v334_v3 = vsel %vm333_vm9, %v465_v53, %v330_v1 }
 0x15e   :  { %v339_v4 = vsel %vm336_vm10, %v338_v2, %v334_v3  ;;  %v471_v17 = vpop.eup %470  ;;  %v383_v2 = vld [vmem:[%s827_s0] sm:$0xff]  ;;  %v384_v3 = vld [vmem:[%s827_s0 + $0x8] sm:$0xff] }
 0x15f   :  { %v346_v5 = vadd.f32 0.0001, %v339_v4  ;;  %v272_v18 = vmul.f32 %v471_v17, %v269_v14  ;;  %v473_v20 = vpop.eup %472  ;;  %vm277_vm11 = vweird.f32 %v471_v17  ;;  %v385_v4 = vld [vmem:[%s827_s0 + $0x10] sm:$0xff]  ;;  %v390_v14 = vld [vmem:[%s827_s0 + $0x38] sm:$0xff] }
 0x160   :  { %v287_v23 = vmul.f32 %v473_v20, %v270_v16  ;;  %vm278_vm13 = vmor %vm276_vm12, %vm277_vm11  ;;  %vm292_vm15 = vweird.f32 %v473_v20 }
 0x161   :  { %v348_v6 = vmul.f32 %v346_v5, %v346_v5  ;;  %v273_v19 = vsub.f32 1.0, %v272_v18  ;;  %vm293_vm1 = vmor %vm291_vm0, %vm292_vm15  ;;  %v386_v5 = vld [vmem:[%s827_s0 + $0x18] sm:$0xff] }
 0x162   :  { %v288_v25 = vsub.f32 1.0, %v287_v23 }
 0x163   :  { %v274_v22 = vmul.f32 %v471_v17, %v273_v19 }
 0x164   :  { %v289_v29 = vmul.f32 %v473_v20, %v288_v25 }
 0x165   :  { %353 = vrot.lane.b32.xlu0 %v348_v6, %s504_s4  ;;  %v275_v24 = vadd.f32 %v471_v17, %v274_v22 }
 0x166   :  { %v290_v32 = vadd.f32 %v473_v20, %v289_v29 }
 0x167   :  { %v279_v28 = vsel %vm278_vm13, %v471_v17, %v275_v24 }
 0x168   :  { %v284_v31 = vsel %vm281_vm14, %v283_v30, %v279_v28  ;;  %v294_v36 = vsel %vm293_vm1, %v473_v20, %v290_v32 }
 0x169   :  { %v341_v34 = vadd.f32 0.0001, %v284_v31  ;;  %v299_v40 = vsel %vm296_vm2, %v298_v37, %v294_v36 }
 0x16a   :  { %v342_v42 = vadd.f32 0.0001, %v299_v40 }
 0x16b   :  { %v343_v38 = vmul.f32 %v341_v34, %v341_v34 }
 0x16c   :  { %v344_v43 = vmul.f32 %v342_v42, %v342_v42 }
 0x1cf   :  { %v352_v39 = vpop.permute.xlu0 %351 }
 0x1d0   :  { %v357_v41 = vadd.f32 %v352_v39, %v343_v38 }
 0x1d2   :  { %474 = vrsqrt.f32 %v357_v41  ;;  %vm366_vm3 = vcmp.eq.f32.partialorder %v357_v41, inf  ;;  %v369_v56 = vand.u32 2147483648, %v357_v41  ;;  %vm368_vm4 = vcmp.eq.f32.partialorder %v357_v41, 0.0 }
 0x1d7   :  { %v354_v44 = vpop.permute.xlu0 %353 }
 0x1d8   :  { %v475_v45 = vpop.eup %474  ;;  %v358_v46 = vadd.f32 %v354_v44, %v344_v43 }
 0x1d9   :  { %v360_v47 = vmul.f32 %v475_v45, %v357_v41 }
 0x1da   :  { %476 = vrsqrt.f32 %v358_v46  ;;  %vm378_vm5 = vcmp.eq.f32.partialorder %v358_v46, inf  ;;  %v381_v63 = vand.u32 2147483648, %v358_v46  ;;  %vm380_vm6 = vcmp.eq.f32.partialorder %v358_v46, 0.0 }
 0x1db   :  { %v361_v48 = vmul.f32 %v475_v45, %v360_v47 }
 0x1dd   :  { %v362_v49 = vmul.f32 0.5, %v361_v48 }
 0x1df   :  { %v363_v50 = vsub.f32 1.5, %v362_v49 }
 0x1e0   :  { %v477_v51 = vpop.eup %476 }
 0x1e1   :  { %v364_v52 = vmul.f32 %v475_v45, %v363_v50  ;;  %v372_v53 = vmul.f32 %v477_v51, %v358_v46 }
 0x1e3   :  { %v365_v54 = vmul.f32 %v364_v52, %v357_v41  ;;  %v373_v55 = vmul.f32 %v477_v51, %v372_v53 }
 0x1e5   :  { %v367_v57 = vsel %vm366_vm3, %v357_v41, %v365_v54  ;;  %v374_v58 = vmul.f32 0.5, %v373_v55 }
 0x1e6   :  { %v370_v59 = vsel %vm368_vm4, %v369_v56, %v367_v57 }
 0x1e7   :  { %393 = vperm.xlu1 %456, %v370_v59   ;;  %v375_v60 = vsub.f32 1.5, %v374_v58 }
 0x1e9   :  { %v376_v61 = vmul.f32 %v477_v51, %v375_v60 }
 0x1eb   :  { %v377_v62 = vmul.f32 %v376_v61, %v358_v46 }
 0x1ed   :  { %v379_v0 = vsel %vm378_vm5, %v358_v46, %v377_v62 }
 0x1ee   :  { %v382_v1 = vsel %vm380_vm6, %v381_v63, %v379_v0 }
 0x1ef   :  { %398 = vperm.xlu1 %456, %v382_v1  }
 0x259   :  { %v394_v6 = vpop.permute.xlu1 %393 }
 0x25a   :  { %v401_v7 = vmul.f32 %v394_v6, %v383_v2  ;;  %v402_v8 = vmul.f32 %v394_v6, %v384_v3  ;;  %v403_v9 = vmul.f32 %v394_v6, %v385_v4  ;;  %v404_v10 = vmul.f32 %v394_v6, %v386_v5 }
 0x25c   :  { %409 = vst [vmem:[#allocation2] sm:$0xff] %v401_v7 }
 0x25d   :  { %410 = vst [vmem:[#allocation2 + $0x8] sm:$0xff] %v402_v8 }
 0x25e   :  { %411 = vst [vmem:[#allocation2 + $0x10] sm:$0xff] %v403_v9 }
 0x25f   :  { %412 = vst [vmem:[#allocation2 + $0x18] sm:$0xff] %v404_v10 }
 0x261   :  { %v399_v15 = vpop.permute.xlu1 %398 }
 0x262   :  { %v405_v16 = vmul.f32 %v399_v15, %v387_v11  ;;  %v406_v17 = vmul.f32 %v399_v15, %v388_v12  ;;  %v407_v18 = vmul.f32 %v399_v15, %v389_v13  ;;  %v408_v19 = vmul.f32 %v399_v15, %v390_v14 }
 0x264   :  { %413 = vst [vmem:[#allocation2 + $0x20] sm:$0xff] %v405_v16 }
 0x265   :  { %414 = vst [vmem:[#allocation2 + $0x28] sm:$0xff] %v406_v17 }
 0x266   :  { %415 = vst [vmem:[#allocation2 + $0x30] sm:$0xff] %v407_v18 }
 0x267   :  { %416 = vst [vmem:[#allocation2 + $0x38] sm:$0xff] %v408_v19 }
 0x268   :  { %429 = dma.vmem_to_hbm [thread:$0]  %s422_s21, 1024, %s424_s1, [#allocation3], %s507_s3, %s507_s3, %s508_s24  }
 0x269   :  { %502 = dma.done.wait [#allocation3], 1024  }
 0x26a   :  { %503 = vsyncadd [#allocation3], 4294966272 }
 0x26b   :  { %434 = vsyncpa [#allocation3], 1 }

</bundles_post_ra>
